<compile_context>
chip_gen: v7x
topology: tpu7x:2x2x1
jax: 0.10.0
libtpu: 0.0.40
codegen_flags: <defaults>
</compile_context>

<pallas_src>
import functools

import jax
import jax.numpy as jnp
from jax import lax
from jax.experimental import pallas as pl
from jax.experimental.pallas import tpu as pltpu


def _log_sigmoid(x):
    # Numerically stable log(sigmoid(x)) = min(x, 0) - log(1 + exp(-|x|))
    return jnp.minimum(x, 0.0) - jnp.log(1.0 + jnp.exp(-jnp.abs(x)))


def _sgns_tile_kernel(
    center_ref,    # VMEM (tb, D)   -- pipelined center-embedding tile
    ctx_idx_ref,   # VMEM (tb, 1)   -- pipelined context indices (int32)
    neg_idx_ref,   # VMEM (tb, K)   -- pipelined negative indices (int32)
    table_ref,     # VMEM (V, D)    -- output-embedding table, resident (same block every step)
    out_ref,       # VMEM (1, 8, 128) f32 -- per-tile partial sums
    *,
    batch: int,    # true (unpadded) batch size
    tb: int,       # batch tile size (multiple of 8)
    num_neg: int,  # K
    vocab: int,    # V
):
    i = pl.program_id(0)
    base = i * tb

    center = center_ref[...]            # (tb, D)
    table = table_ref[...]              # (V, D)

    # One MXU matmul: affinity of every row in this tile vs every vocab row.
    # f32 accumulation; HIGHEST precision so f32 tables match the reference.
    scores = jnp.einsum(
        "bd,vd->bv", center, table,
        preferred_element_type=jnp.float32,
        precision=lax.Precision.HIGHEST)                             # (tb, V)

    # Mask for padded tail rows of the last tile.
    row_ids = base + lax.broadcasted_iota(jnp.int32, (tb, 1), 0)     # (tb, 1)
    valid = (row_ids < batch).astype(jnp.float32)                    # (tb, 1)

    vocab_ids = lax.broadcasted_iota(jnp.int32, (tb, vocab), 1)      # (tb, V)

    # Positive (context) term: fused gather = one-hot column select of scores.
    ctx_idx = ctx_idx_ref[...]                                       # (tb, 1)
    ctx_aff = jnp.sum(jnp.where(vocab_ids == ctx_idx, scores, 0.0),
                      axis=-1, keepdims=True)                        # (tb, 1)
    pos_sum = jnp.sum(_log_sigmoid(ctx_aff) * valid)                 # scalar

    # Negative terms: K static column selects (K is small & static).
    neg_idx = neg_idx_ref[...]                                       # (tb, K)
    neg_sum = jnp.zeros((), jnp.float32)
    for k in range(num_neg):
        nk = neg_idx[:, k:k + 1]                                     # (tb, 1)
        aff = jnp.sum(jnp.where(vocab_ids == nk, scores, 0.0),
                      axis=-1, keepdims=True)                        # (tb, 1)
        neg_sum = neg_sum + jnp.sum(_log_sigmoid(-aff) * valid)

    # Emit per-tile partial sums in a lane/sublane aligned (8,128) block:
    # element (0,0) = positive sum, (0,1) = negative sum, rest zero.
    sub = lax.broadcasted_iota(jnp.int32, (8, 128), 0)
    lane = lax.broadcasted_iota(jnp.int32, (8, 128), 1)
    blk = jnp.where((sub == 0) & (lane == 0), pos_sum,
                    jnp.where((sub == 0) & (lane == 1), neg_sum, 0.0))
    out_ref[0] = blk.astype(jnp.float32)


def sgns_forward(input_embedding, output_embedding, center, context, negatives,
                 *, tb=None):
    """Pallas-backed SGNS forward pass.

    input_embedding / output_embedding: (V, D) float arrays
    center, context: (B,) int32 indices; negatives: (B, K) int32 indices
    Returns scalar float32 loss.
    """
    V, D = (int(s) for s in output_embedding.shape)
    B = int(center.shape[0])
    K = int(negatives.shape[1])

    if tb is None:
        # Megacore-friendly default: aim for >= 2 tiles (v7x has 2 TCs),
        # sublane-aligned, capped so per-tile temporaries stay modest.
        tb = min(256, max(8, ((-(-B // 2) + 7) // 8) * 8))
    tb = max(8, ((int(tb) + 7) // 8) * 8)          # sublane-aligned tile
    num_tiles = -(-B // tb)
    b_pad = num_tiles * tb

    # Small (B, D) center gather stays as XLA glue (it uses the *input* table).
    center_emb = input_embedding[center]                       # (B, D)
    ctx_idx = context.astype(jnp.int32).reshape(B, 1)           # (B, 1)
    neg_idx = negatives.astype(jnp.int32)                       # (B, K)

    if b_pad != B:
        pad = b_pad - B
        center_emb = jnp.pad(center_emb, ((0, pad), (0, 0)))
        ctx_idx = jnp.pad(ctx_idx, ((0, pad), (0, 0)))           # idx 0 valid; rows masked
        neg_idx = jnp.pad(neg_idx, ((0, pad), (0, 0)))

    # VMEM budget from actual buffer sizes (resident table may be double
    # buffered by the pipeline; scores/mask temporaries counted generously).
    table_bytes = V * D * output_embedding.dtype.itemsize
    center_bytes = tb * D * center_emb.dtype.itemsize
    idx_bytes = tb * (K + 1) * 4
    out_bytes = 8 * 128 * 4
    scores_bytes = tb * V * 4
    vmem_limit = (2 * (table_bytes + center_bytes + idx_bytes + out_bytes)
                  + 8 * scores_bytes + (4 << 20))
    vmem_limit = int(min(max(vmem_limit, 16 << 20), 64 << 20))

    kernel = functools.partial(
        _sgns_tile_kernel, batch=B, tb=tb, num_neg=K, vocab=V)

    partials = pl.pallas_call(
        kernel,
        out_shape=jax.ShapeDtypeStruct((num_tiles, 8, 128), jnp.float32),
        grid_spec=pltpu.PrefetchScalarGridSpec(
            num_scalar_prefetch=0,
            grid=(num_tiles,),
            in_specs=[
                pl.BlockSpec((tb, D), lambda i: (i, 0)),    # center tile
                pl.BlockSpec((tb, 1), lambda i: (i, 0)),    # context indices
                pl.BlockSpec((tb, K), lambda i: (i, 0)),    # negative indices
                pl.BlockSpec((V, D), lambda i: (0, 0)),     # resident output table
            ],
            out_specs=pl.BlockSpec((1, 8, 128), lambda i: (i, 0, 0)),
        ),
        compiler_params=pltpu.CompilerParams(
            dimension_semantics=("parallel",),      # shard tiles over 2 TCs on v7x
            vmem_limit_bytes=vmem_limit,
        ),
    )(center_emb, ctx_idx, neg_idx, output_embedding)

    # Final tiny reduction + single division (kernel emits sums, not means).
    pos_total = jnp.sum(partials[:, 0, 0])
    neg_total = jnp.sum(partials[:, 0, 1])
    return -(pos_total / B) - (neg_total / (B * K))


def sgns_forward_ref(input_embedding, output_embedding, center, context, negatives):
    """Pure-JAX reference for correctness checking."""
    center_emb = input_embedding[center]
    context_emb = output_embedding[context]
    neg_emb = output_embedding[negatives]
    ctx_aff = jnp.sum(center_emb * context_emb, axis=1)
    neg_aff = jnp.einsum("bkd,bd->bk", neg_emb, center_emb,
                         precision=jax.lax.Precision.HIGHEST)
    return (-jnp.mean(jax.nn.log_sigmoid(ctx_aff))
            - jnp.mean(jax.nn.log_sigmoid(-neg_aff)))


if __name__ == "__main__":
    # Small, deterministic synthetic setup.
    VOCAB = 64
    EMBED_DIM = 128      # lane-friendly embedding dim
    BATCH = 20           # deliberately NOT a multiple of the tile (tests tail masking)
    NUM_NEG = 6

    key = jax.random.PRNGKey(0)
    k_in, k_out, k_c, k_ctx, k_neg = jax.random.split(key, 5)

    input_embedding = 0.1 * jax.random.normal(k_in, (VOCAB, EMBED_DIM), jnp.float32)
    output_embedding = 0.1 * jax.random.normal(k_out, (VOCAB, EMBED_DIM), jnp.float32)

    center = jax.random.randint(k_c, (BATCH,), 0, VOCAB, jnp.int32)
    context = jax.random.randint(k_ctx, (BATCH,), 0, VOCAB, jnp.int32)
    negatives = jax.random.randint(k_neg, (BATCH, NUM_NEG), 0, VOCAB, jnp.int32)

    # tb=8 -> 3 batch tiles, last tile partially masked.
    loss = sgns_forward(input_embedding, output_embedding, center, context,
                        negatives, tb=8)
    loss = jax.block_until_ready(loss)

    loss_ref = sgns_forward_ref(input_embedding, output_embedding,
                                center, context, negatives)
    assert jnp.allclose(loss, loss_ref, atol=1e-5, rtol=1e-4), (loss, loss_ref)

    print("KERNEL_OK")
</pallas_src>

<mosaic_0001>
module attributes {stable_mosaic.version = 11 : i64} {
  func.func @_sgns_tile_kernel(%arg0: i32, %arg1: memref<8x128xf32, #tpu.memory_space<vmem>>, %arg2: memref<8x1xi32, #tpu.memory_space<vmem>>, %arg3: memref<8x6xi32, #tpu.memory_space<vmem>>, %arg4: memref<64x128xf32, #tpu.memory_space<vmem>>, %arg5: memref<1x8x128xf32, #tpu.memory_space<vmem>>) attributes {dimension_semantics = [#tpu.dimension_semantics<parallel>], iteration_bounds = array<i64: 3>, scalar_prefetch = 0 : i64, scratch_operands = 0 : i64, tpu.core_type = #tpu.core_type<tc>, window_params = [{transform_indices = @transform_0, window_bounds = array<i64: 8, 128>}, {transform_indices = @transform_1, window_bounds = array<i64: 8, 1>}, {transform_indices = @transform_2, window_bounds = array<i64: 8, 6>}, {pipeline_mode = #tpu.pipeline_mode<synchronous>, transform_indices = @transform_3, window_bounds = array<i64: 64, 128>}, {transform_indices = @transform_4, window_bounds = array<i64: 1, 8, 128>}]} {
    %c8_i32 = arith.constant 8 : i32
    %0 = arith.muli %arg0, %c8_i32 : i32
    %c0 = arith.constant 0 : index
    %c0_0 = arith.constant 0 : index
    %1 = vector.load %arg1[%c0, %c0_0] : memref<8x128xf32, #tpu.memory_space<vmem>>, vector<8x128xf32>
    %c0_1 = arith.constant 0 : index
    %c0_2 = arith.constant 0 : index
    %2 = vector.load %arg4[%c0_1, %c0_2] : memref<64x128xf32, #tpu.memory_space<vmem>>, vector<64x128xf32>
    "tpu.trace_start"() <{level = 10 : i32, message = "bd,vd->bv"}> : () -> ()
    %cst = arith.constant dense<0.000000e+00> : vector<8x64xf32>
    %3 = tpu.matmul %1, %2, %cst {dimension_numbers = #tpu.dot_dimension_numbers<[1], [1], [0], [0], [0, 0, 1, 0], [], []>, precision = #tpu.contract_precision<fp32>} : vector<8x128xf32>, vector<64x128xf32>, vector<8x64xf32> -> vector<8x64xf32>
    "tpu.trace_stop"() : () -> ()
    %4 = tpu.iota {dimensions = array<i32: 0>} : vector<8x1xi32>
    %5 = vector.broadcast %0 : i32 to vector<8x1xi32>
    %6 = arith.addi %5, %4 : vector<8x1xi32>
    %c20_i32 = arith.constant 20 : i32
    %7 = vector.broadcast %c20_i32 : i32 to vector<8x1xi32>
    %8 = arith.cmpi slt, %6, %7 : vector<8x1xi32>
    %9 = arith.extui %8 : vector<8x1xi1> to vector<8x1xi32>
    %10 = arith.sitofp %9 : vector<8x1xi32> to vector<8x1xf32>
    %11 = tpu.iota {dimensions = array<i32: 1>} : vector<8x64xi32>
    %c0_3 = arith.constant 0 : index
    %c0_4 = arith.constant 0 : index
    %12 = vector.load %arg2[%c0_3, %c0_4] : memref<8x1xi32, #tpu.memory_space<vmem>>, vector<8x1xi32>
    %13 = vector.broadcast %12 : vector<8x1xi32> to vector<8x64xi32>
    %14 = arith.cmpi eq, %11, %13 : vector<8x64xi32>
    %cst_5 = arith.constant 0.000000e+00 : f32
    %15 = vector.broadcast %cst_5 : f32 to vector<8x64xf32>
    %16 = arith.select %14, %3, %15 : vector<8x64xi1>, vector<8x64xf32>
    %cst_6 = arith.constant dense<0.000000e+00> : vector<8xf32>
    %17 = vector.multi_reduction <add>, %16, %cst_6 [1] : vector<8x64xf32> to vector<8xf32>
    %18 = vector.shape_cast %17 : vector<8xf32> to vector<8x1xf32>
    %cst_7 = arith.constant 0.000000e+00 : f32
    %19 = vector.broadcast %cst_7 : f32 to vector<8x1xf32>
    %20 = arith.minimumf %18, %19 : vector<8x1xf32>
    %21 = math.absf %18 : vector<8x1xf32>
    %cst_8 = arith.constant 0.000000e+00 : f32
    %22 = vector.broadcast %cst_8 : f32 to vector<8x1xf32>
    %23 = arith.subf %22, %21 : vector<8x1xf32>
    %24 = math.exp %23 : vector<8x1xf32>
    %cst_9 = arith.constant 1.000000e+00 : f32
    %25 = vector.broadcast %cst_9 : f32 to vector<8x1xf32>
    %26 = arith.addf %25, %24 : vector<8x1xf32>
    %27 = math.log %26 : vector<8x1xf32>
    %28 = arith.subf %20, %27 : vector<8x1xf32>
    %29 = arith.mulf %28, %10 : vector<8x1xf32>
    %30 = vector.shape_cast %29 : vector<8x1xf32> to vector<1x8x1xf32>
    %cst_10 = arith.constant dense<0.000000e+00> : vector<1xf32>
    %31 = vector.multi_reduction <add>, %30, %cst_10 [1, 2] : vector<1x8x1xf32> to vector<1xf32>
    %32 = vector.shape_cast %31 : vector<1xf32> to vector<1x1x1xf32>
    %33 = vector.extract %32[0, 0, 0] : f32 from vector<1x1x1xf32>
    %c0_11 = arith.constant 0 : index
    %c0_12 = arith.constant 0 : index
    %34 = vector.load %arg3[%c0_11, %c0_12] : memref<8x6xi32, #tpu.memory_space<vmem>>, vector<8x6xi32>
    %35 = vector.extract_strided_slice %34 {offsets = [0, 0], sizes = [8, 1], strides = [1, 1]} : vector<8x6xi32> to vector<8x1xi32>
    %36 = vector.broadcast %35 : vector<8x1xi32> to vector<8x64xi32>
    %37 = arith.cmpi eq, %11, %36 : vector<8x64xi32>
    %cst_13 = arith.constant 0.000000e+00 : f32
    %38 = vector.broadcast %cst_13 : f32 to vector<8x64xf32>
    %39 = arith.select %37, %3, %38 : vector<8x64xi1>, vector<8x64xf32>
    %cst_14 = arith.constant dense<0.000000e+00> : vector<8xf32>
    %40 = vector.multi_reduction <add>, %39, %cst_14 [1] : vector<8x64xf32> to vector<8xf32>
    %41 = vector.shape_cast %40 : vector<8xf32> to vector<8x1xf32>
    %cst_15 = arith.constant 0.000000e+00 : f32
    %42 = vector.broadcast %cst_15 : f32 to vector<8x1xf32>
    %43 = arith.subf %42, %41 : vector<8x1xf32>
    %cst_16 = arith.constant 0.000000e+00 : f32
    %44 = vector.broadcast %cst_16 : f32 to vector<8x1xf32>
    %45 = arith.minimumf %43, %44 : vector<8x1xf32>
    %46 = math.absf %43 : vector<8x1xf32>
    %cst_17 = arith.constant 0.000000e+00 : f32
    %47 = vector.broadcast %cst_17 : f32 to vector<8x1xf32>
    %48 = arith.subf %47, %46 : vector<8x1xf32>
    %49 = math.exp %48 : vector<8x1xf32>
    %cst_18 = arith.constant 1.000000e+00 : f32
    %50 = vector.broadcast %cst_18 : f32 to vector<8x1xf32>
    %51 = arith.addf %50, %49 : vector<8x1xf32>
    %52 = math.log %51 : vector<8x1xf32>
    %53 = arith.subf %45, %52 : vector<8x1xf32>
    %54 = arith.mulf %53, %10 : vector<8x1xf32>
    %55 = vector.shape_cast %54 : vector<8x1xf32> to vector<1x8x1xf32>
    %cst_19 = arith.constant dense<0.000000e+00> : vector<1xf32>
    %56 = vector.multi_reduction <add>, %55, %cst_19 [1, 2] : vector<1x8x1xf32> to vector<1xf32>
    %57 = vector.shape_cast %56 : vector<1xf32> to vector<1x1x1xf32>
    %58 = vector.extract %57[0, 0, 0] : f32 from vector<1x1x1xf32>
    %cst_20 = arith.constant 0.000000e+00 : f32
    %59 = arith.addf %cst_20, %58 : f32
    %60 = vector.extract_strided_slice %34 {offsets = [0, 1], sizes = [8, 1], strides = [1, 1]} : vector<8x6xi32> to vector<8x1xi32>
    %61 = vector.broadcast %60 : vector<8x1xi32> to vector<8x64xi32>
    %62 = arith.cmpi eq, %11, %61 : vector<8x64xi32>
    %cst_21 = arith.constant 0.000000e+00 : f32
    %63 = vector.broadcast %cst_21 : f32 to vector<8x64xf32>
    %64 = arith.select %62, %3, %63 : vector<8x64xi1>, vector<8x64xf32>
    %cst_22 = arith.constant dense<0.000000e+00> : vector<8xf32>
    %65 = vector.multi_reduction <add>, %64, %cst_22 [1] : vector<8x64xf32> to vector<8xf32>
    %66 = vector.shape_cast %65 : vector<8xf32> to vector<8x1xf32>
    %cst_23 = arith.constant 0.000000e+00 : f32
    %67 = vector.broadcast %cst_23 : f32 to vector<8x1xf32>
    %68 = arith.subf %67, %66 : vector<8x1xf32>
    %cst_24 = arith.constant 0.000000e+00 : f32
    %69 = vector.broadcast %cst_24 : f32 to vector<8x1xf32>
    %70 = arith.minimumf %68, %69 : vector<8x1xf32>
    %71 = math.absf %68 : vector<8x1xf32>
    %cst_25 = arith.constant 0.000000e+00 : f32
    %72 = vector.broadcast %cst_25 : f32 to vector<8x1xf32>
    %73 = arith.subf %72, %71 : vector<8x1xf32>
    %74 = math.exp %73 : vector<8x1xf32>
    %cst_26 = arith.constant 1.000000e+00 : f32
    %75 = vector.broadcast %cst_26 : f32 to vector<8x1xf32>
    %76 = arith.addf %75, %74 : vector<8x1xf32>
    %77 = math.log %76 : vector<8x1xf32>
    %78 = arith.subf %70, %77 : vector<8x1xf32>
    %79 = arith.mulf %78, %10 : vector<8x1xf32>
    %80 = vector.shape_cast %79 : vector<8x1xf32> to vector<1x8x1xf32>
    %cst_27 = arith.constant dense<0.000000e+00> : vector<1xf32>
    %81 = vector.multi_reduction <add>, %80, %cst_27 [1, 2] : vector<1x8x1xf32> to vector<1xf32>
    %82 = vector.shape_cast %81 : vector<1xf32> to vector<1x1x1xf32>
    %83 = vector.extract %82[0, 0, 0] : f32 from vector<1x1x1xf32>
    %84 = arith.addf %59, %83 : f32
    %85 = vector.extract_strided_slice %34 {offsets = [0, 2], sizes = [8, 1], strides = [1, 1]} : vector<8x6xi32> to vector<8x1xi32>
    %86 = vector.broadcast %85 : vector<8x1xi32> to vector<8x64xi32>
    %87 = arith.cmpi eq, %11, %86 : vector<8x64xi32>
    %cst_28 = arith.constant 0.000000e+00 : f32
    %88 = vector.broadcast %cst_28 : f32 to vector<8x64xf32>
    %89 = arith.select %87, %3, %88 : vector<8x64xi1>, vector<8x64xf32>
    %cst_29 = arith.constant dense<0.000000e+00> : vector<8xf32>
    %90 = vector.multi_reduction <add>, %89, %cst_29 [1] : vector<8x64xf32> to vector<8xf32>
    %91 = vector.shape_cast %90 : vector<8xf32> to vector<8x1xf32>
    %cst_30 = arith.constant 0.000000e+00 : f32
    %92 = vector.broadcast %cst_30 : f32 to vector<8x1xf32>
    %93 = arith.subf %92, %91 : vector<8x1xf32>
    %cst_31 = arith.constant 0.000000e+00 : f32
    %94 = vector.broadcast %cst_31 : f32 to vector<8x1xf32>
    %95 = arith.minimumf %93, %94 : vector<8x1xf32>
    %96 = math.absf %93 : vector<8x1xf32>
    %cst_32 = arith.constant 0.000000e+00 : f32
    %97 = vector.broadcast %cst_32 : f32 to vector<8x1xf32>
    %98 = arith.subf %97, %96 : vector<8x1xf32>
    %99 = math.exp %98 : vector<8x1xf32>
    %cst_33 = arith.constant 1.000000e+00 : f32
    %100 = vector.broadcast %cst_33 : f32 to vector<8x1xf32>
    %101 = arith.addf %100, %99 : vector<8x1xf32>
    %102 = math.log %101 : vector<8x1xf32>
    %103 = arith.subf %95, %102 : vector<8x1xf32>
    %104 = arith.mulf %103, %10 : vector<8x1xf32>
    %105 = vector.shape_cast %104 : vector<8x1xf32> to vector<1x8x1xf32>
    %cst_34 = arith.constant dense<0.000000e+00> : vector<1xf32>
    %106 = vector.multi_reduction <add>, %105, %cst_34 [1, 2] : vector<1x8x1xf32> to vector<1xf32>
    %107 = vector.shape_cast %106 : vector<1xf32> to vector<1x1x1xf32>
    %108 = vector.extract %107[0, 0, 0] : f32 from vector<1x1x1xf32>
    %109 = arith.addf %84, %108 : f32
    %110 = vector.extract_strided_slice %34 {offsets = [0, 3], sizes = [8, 1], strides = [1, 1]} : vector<8x6xi32> to vector<8x1xi32>
    %111 = vector.broadcast %110 : vector<8x1xi32> to vector<8x64xi32>
    %112 = arith.cmpi eq, %11, %111 : vector<8x64xi32>
    %cst_35 = arith.constant 0.000000e+00 : f32
    %113 = vector.broadcast %cst_35 : f32 to vector<8x64xf32>
    %114 = arith.select %112, %3, %113 : vector<8x64xi1>, vector<8x64xf32>
    %cst_36 = arith.constant dense<0.000000e+00> : vector<8xf32>
    %115 = vector.multi_reduction <add>, %114, %cst_36 [1] : vector<8x64xf32> to vector<8xf32>
    %116 = vector.shape_cast %115 : vector<8xf32> to vector<8x1xf32>
    %cst_37 = arith.constant 0.000000e+00 : f32
    %117 = vector.broadcast %cst_37 : f32 to vector<8x1xf32>
    %118 = arith.subf %117, %116 : vector<8x1xf32>
    %cst_38 = arith.constant 0.000000e+00 : f32
    %119 = vector.broadcast %cst_38 : f32 to vector<8x1xf32>
    %120 = arith.minimumf %118, %119 : vector<8x1xf32>
    %121 = math.absf %118 : vector<8x1xf32>
    %cst_39 = arith.constant 0.000000e+00 : f32
    %122 = vector.broadcast %cst_39 : f32 to vector<8x1xf32>
    %123 = arith.subf %122, %121 : vector<8x1xf32>
    %124 = math.exp %123 : vector<8x1xf32>
    %cst_40 = arith.constant 1.000000e+00 : f32
    %125 = vector.broadcast %cst_40 : f32 to vector<8x1xf32>
    %126 = arith.addf %125, %124 : vector<8x1xf32>
    %127 = math.log %126 : vector<8x1xf32>
    %128 = arith.subf %120, %127 : vector<8x1xf32>
    %129 = arith.mulf %128, %10 : vector<8x1xf32>
    %130 = vector.shape_cast %129 : vector<8x1xf32> to vector<1x8x1xf32>
    %cst_41 = arith.constant dense<0.000000e+00> : vector<1xf32>
    %131 = vector.multi_reduction <add>, %130, %cst_41 [1, 2] : vector<1x8x1xf32> to vector<1xf32>
    %132 = vector.shape_cast %131 : vector<1xf32> to vector<1x1x1xf32>
    %133 = vector.extract %132[0, 0, 0] : f32 from vector<1x1x1xf32>
    %134 = arith.addf %109, %133 : f32
    %135 = vector.extract_strided_slice %34 {offsets = [0, 4], sizes = [8, 1], strides = [1, 1]} : vector<8x6xi32> to vector<8x1xi32>
    %136 = vector.broadcast %135 : vector<8x1xi32> to vector<8x64xi32>
    %137 = arith.cmpi eq, %11, %136 : vector<8x64xi32>
    %cst_42 = arith.constant 0.000000e+00 : f32
    %138 = vector.broadcast %cst_42 : f32 to vector<8x64xf32>
    %139 = arith.select %137, %3, %138 : vector<8x64xi1>, vector<8x64xf32>
    %cst_43 = arith.constant dense<0.000000e+00> : vector<8xf32>
    %140 = vector.multi_reduction <add>, %139, %cst_43 [1] : vector<8x64xf32> to vector<8xf32>
    %141 = vector.shape_cast %140 : vector<8xf32> to vector<8x1xf32>
    %cst_44 = arith.constant 0.000000e+00 : f32
    %142 = vector.broadcast %cst_44 : f32 to vector<8x1xf32>
    %143 = arith.subf %142, %141 : vector<8x1xf32>
    %cst_45 = arith.constant 0.000000e+00 : f32
    %144 = vector.broadcast %cst_45 : f32 to vector<8x1xf32>
    %145 = arith.minimumf %143, %144 : vector<8x1xf32>
    %146 = math.absf %143 : vector<8x1xf32>
    %cst_46 = arith.constant 0.000000e+00 : f32
    %147 = vector.broadcast %cst_46 : f32 to vector<8x1xf32>
    %148 = arith.subf %147, %146 : vector<8x1xf32>
    %149 = math.exp %148 : vector<8x1xf32>
    %cst_47 = arith.constant 1.000000e+00 : f32
    %150 = vector.broadcast %cst_47 : f32 to vector<8x1xf32>
    %151 = arith.addf %150, %149 : vector<8x1xf32>
    %152 = math.log %151 : vector<8x1xf32>
    %153 = arith.subf %145, %152 : vector<8x1xf32>
    %154 = arith.mulf %153, %10 : vector<8x1xf32>
    %155 = vector.shape_cast %154 : vector<8x1xf32> to vector<1x8x1xf32>
    %cst_48 = arith.constant dense<0.000000e+00> : vector<1xf32>
    %156 = vector.multi_reduction <add>, %155, %cst_48 [1, 2] : vector<1x8x1xf32> to vector<1xf32>
    %157 = vector.shape_cast %156 : vector<1xf32> to vector<1x1x1xf32>
    %158 = vector.extract %157[0, 0, 0] : f32 from vector<1x1x1xf32>
    %159 = arith.addf %134, %158 : f32
    %160 = vector.extract_strided_slice %34 {offsets = [0, 5], sizes = [8, 1], strides = [1, 1]} : vector<8x6xi32> to vector<8x1xi32>
    %161 = vector.broadcast %160 : vector<8x1xi32> to vector<8x64xi32>
    %162 = arith.cmpi eq, %11, %161 : vector<8x64xi32>
    %cst_49 = arith.constant 0.000000e+00 : f32
    %163 = vector.broadcast %cst_49 : f32 to vector<8x64xf32>
    %164 = arith.select %162, %3, %163 : vector<8x64xi1>, vector<8x64xf32>
    %cst_50 = arith.constant dense<0.000000e+00> : vector<8xf32>
    %165 = vector.multi_reduction <add>, %164, %cst_50 [1] : vector<8x64xf32> to vector<8xf32>
    %166 = vector.shape_cast %165 : vector<8xf32> to vector<8x1xf32>
    %cst_51 = arith.constant 0.000000e+00 : f32
    %167 = vector.broadcast %cst_51 : f32 to vector<8x1xf32>
    %168 = arith.subf %167, %166 : vector<8x1xf32>
    %cst_52 = arith.constant 0.000000e+00 : f32
    %169 = vector.broadcast %cst_52 : f32 to vector<8x1xf32>
    %170 = arith.minimumf %168, %169 : vector<8x1xf32>
    %171 = math.absf %168 : vector<8x1xf32>
    %cst_53 = arith.constant 0.000000e+00 : f32
    %172 = vector.broadcast %cst_53 : f32 to vector<8x1xf32>
    %173 = arith.subf %172, %171 : vector<8x1xf32>
    %174 = math.exp %173 : vector<8x1xf32>
    %cst_54 = arith.constant 1.000000e+00 : f32
    %175 = vector.broadcast %cst_54 : f32 to vector<8x1xf32>
    %176 = arith.addf %175, %174 : vector<8x1xf32>
    %177 = math.log %176 : vector<8x1xf32>
    %178 = arith.subf %170, %177 : vector<8x1xf32>
    %179 = arith.mulf %178, %10 : vector<8x1xf32>
    %180 = vector.shape_cast %179 : vector<8x1xf32> to vector<1x8x1xf32>
    %cst_55 = arith.constant dense<0.000000e+00> : vector<1xf32>
    %181 = vector.multi_reduction <add>, %180, %cst_55 [1, 2] : vector<1x8x1xf32> to vector<1xf32>
    %182 = vector.shape_cast %181 : vector<1xf32> to vector<1x1x1xf32>
    %183 = vector.extract %182[0, 0, 0] : f32 from vector<1x1x1xf32>
    %184 = arith.addf %159, %183 : f32
    %185 = tpu.iota {dimensions = array<i32: 0>} : vector<8x128xi32>
    %186 = tpu.iota {dimensions = array<i32: 1>} : vector<8x128xi32>
    %c0_i32 = arith.constant 0 : i32
    %187 = vector.broadcast %c0_i32 : i32 to vector<8x128xi32>
    %188 = arith.cmpi eq, %185, %187 : vector<8x128xi32>
    %c0_i32_56 = arith.constant 0 : i32
    %189 = vector.broadcast %c0_i32_56 : i32 to vector<8x128xi32>
    %190 = arith.cmpi eq, %186, %189 : vector<8x128xi32>
    %191 = arith.andi %188, %190 : vector<8x128xi1>
    %c0_i32_57 = arith.constant 0 : i32
    %192 = vector.broadcast %c0_i32_57 : i32 to vector<8x128xi32>
    %193 = arith.cmpi eq, %185, %192 : vector<8x128xi32>
    %c1_i32 = arith.constant 1 : i32
    %194 = vector.broadcast %c1_i32 : i32 to vector<8x128xi32>
    %195 = arith.cmpi eq, %186, %194 : vector<8x128xi32>
    %196 = arith.andi %193, %195 : vector<8x128xi1>
    %cst_58 = arith.constant 0.000000e+00 : f32
    %197 = vector.broadcast %184 : f32 to vector<8x128xf32>
    %198 = vector.broadcast %cst_58 : f32 to vector<8x128xf32>
    %199 = arith.select %196, %197, %198 : vector<8x128xi1>, vector<8x128xf32>
    %200 = vector.broadcast %33 : f32 to vector<8x128xf32>
    %201 = arith.select %191, %200, %199 : vector<8x128xi1>, vector<8x128xf32>
    %c0_59 = arith.constant 0 : index
    %c0_60 = arith.constant 0 : index
    %c0_61 = arith.constant 0 : index
    %202 = vector.load %arg5[%c0_59, %c0_60, %c0_61] : memref<1x8x128xf32, #tpu.memory_space<vmem>>, vector<1x8x128xf32>
    %203 = vector.shape_cast %202 : vector<1x8x128xf32> to vector<8x128xf32>
    %204 = vector.shape_cast %201 : vector<8x128xf32> to vector<1x8x128xf32>
    tpu.vector_store %arg5[%c0_59, %c0_60, %c0_61], %204 {strides = array<i32>} : memref<1x8x128xf32, #tpu.memory_space<vmem>>, vector<1x8x128xf32>,
    return
  }
  func.func @transform_0(%arg0: i32) -> (i32, i32) {
    %c0_i32 = arith.constant 0 : i32
    %c0_i32_0 = arith.constant 0 : i32
    return %arg0, %c0_i32 : i32, i32
  }
  func.func @transform_1(%arg0: i32) -> (i32, i32) {
    %c0_i32 = arith.constant 0 : i32
    %c0_i32_0 = arith.constant 0 : i32
    return %arg0, %c0_i32 : i32, i32
  }
  func.func @transform_2(%arg0: i32) -> (i32, i32) {
    %c0_i32 = arith.constant 0 : i32
    %c0_i32_0 = arith.constant 0 : i32
    return %arg0, %c0_i32 : i32, i32
  }
  func.func @transform_3(%arg0: i32) -> (i32, i32) {
    %c0_i32 = arith.constant 0 : i32
    %c0_i32_0 = arith.constant 0 : i32
    %c0_i32_1 = arith.constant 0 : i32
    return %c0_i32, %c0_i32_0 : i32, i32
  }
  func.func @transform_4(%arg0: i32) -> (i32, i32, i32) {
    %c0_i32 = arith.constant 0 : i32
    %c0_i32_0 = arith.constant 0 : i32
    %c0_i32_1 = arith.constant 0 : i32
    return %arg0, %c0_i32, %c0_i32_0 : i32, i32, i32
  }
}

</mosaic_0001>

<bundles_post_ra>
// kernel: tpu_custom_call.1
= control target key start
LH: loop header
LB: loop body
LE: loop exit
PB: predicated region body
PF: predicated region fallthrough
CT: control target
= control target key end

     0   :  { %9 = vsyncpa [#allocation3], 0  ;;  %s2011_s0 = inlined_call_operand.hbm [shape: f32[24,128], index: 0, kind: input, shape index: {}]   ;;  %s2012_s1 = inlined_call_operand.vmem [shape: s32[24,1], index: 1, kind: input, shape index: {}]   ;;  %s2013_s2 = inlined_call_operand.vmem [shape: s32[24,6], index: 2, kind: input, shape index: {}]   ;;  %s2014_s3 = inlined_call_operand.vmem [shape: f32[64,128], index: 3, kind: input, shape index: {}]   ;;  %s2015_s4 = inlined_call_operand.hbm [shape: f32[3,8,128], index: 4, kind: output, shape index: {}]  }
   0x1   :  { %11 = vsyncpa [#allocation3 + $0x1], 0 }
   0x2   :  { %12 = vsyncpa [#allocation4], 0 }
   0x3   :  { %14 = vsyncpa [#allocation4 + $0x1], 0  ;;  %s1637_s15 = smov 0   ;;  %s1639_s16 = smov 0  }
   0x4   :  { %s1641_s17 = smov 0   ;;  %s1643_s18 = smov 0  }
   0x5 LB: > { %s1658_s19 = sadd.s32 4294967295, %s1599_s18   ;;  %s1133_s20 = sadd.s32 4294967294, %s1599_s18   ;;  %s1599_s18 = sphi %s1643_s18, %s2029_s18   ;;  %s1595_s17 = sphi %s1641_s17, %s2028_s17   ;;  %s1591_s16 = sphi %s1639_s16, %s2027_s16   ;;  %s1587_s15 = sphi %s1637_s15, %s2026_s15  }
   0x6   : > { %s1662_s21 = sadd.s32 1, %s1599_s18   ;;  %s27_s22 = sadd.s32 1, %s1595_s17 }
   0x7   : > { %s24_s23 = ssub.s32 %s1599_s18, %s1662_s21  ;;  %p34_p0 = scmp.ne.s32.totalorder %s1595_s17, %s1591_s16 }
   0x8   : > { %p25_p1 = scmp.eq.s32.totalorder %s24_s23, 0  ;;  %p35_p2 = scmp.eq.s32.totalorder %s1599_s18, 0 }
   0x9   : > { %p40_p3 = scmp.ne.s32.totalorder %s1591_s16, %s1587_s15  ;;  %p41_p4 = scmp.eq.s32.totalorder %s1658_s19, 0 }
   0xa   : > { %s1674_s24 = scalar_select %p25_p1, %s1595_s17, %s27_s22  }
   0xb   : > { %p1676_p5 = por %p35_p2, %p34_p0  ;;  %p1680_p6 = por %p41_p4, %p40_p3 }
   0xc   : > { %p137_p7 = scmp.eq.s32.totalorder %s1658_s19, 2  ;;  %p143_p8 = scmp.eq.s32.totalorder %s1133_s20, 2 }
   0xd   : > { %p1424_p9 = scmp.lt.s32.totalorder %s1599_s18, 3  ;;  %s166_s29 = sand.u32 1, %s1595_s17  }
   0xe   : > { %p1686_p10 = por %p137_p7, %p34_p0  ;;  %p1690_p11 = por %p143_p8, %p40_p3 }
   0xf   : > { %s1137_s30 = sshll.u32 %s1599_s18, 7  ;;  %s1136_s5 = sshll.u32 %s166_s29, 3 }
  0x10   : > { %s2019_s27 = scalar_select %p1686_p10, 1, 0 }
  0x11   : > { %s2020_s28 = scalar_select %p1690_p11, 1, 0 }
  0x12   : > { %s1699_s8 = scalar_lea.hbm %s2011_s0, %s1137_s30  ;;  %s170_s9 = scalar_lea.vmem [#allocation2], %s1136_s5 }
  0x13   : > { %s177_s10 = sshll.u32 %s170_s9, 4  ;;  %p1703_p12 = pnand %p1424_p9, %p1676_p5  ;;  %s1707_s10 = int_to_ptr.vmem [resolvable:$true] %s177_s10 }
  0x14   : > { %s167_s12 = scalar_lea.sflag [#allocation3], %s166_s29  ;;  %s1503_s13 = scalar_lea.hbm %s1699_s8, 128 }
  0x15   : > { %p1504_p1 = scmp.ne.s32.totalorder %s1699_s8, %s1503_s13  ;;  %p1505_p2 = pneg %p1703_p12 }
  0x16   : > { %s1508_s22 = scalar_lea.hbm %s2011_s0, 384  ;;  %p1509_p5 = scmp.lt.u32.totalorder %s1699_s8, %s2011_s0 }
  0x17   : > { %p1506_p3 = pnand %p1505_p2, %p1504_p1  ;;  %p1510_p7 = scmp.lt.u32.totalorder %s1508_s22, %s1503_s13 }
  0x18   : > { %p1512_p9 = scmp.lt.u32.totalorder %s1503_s13, %s1699_s8 }
  0x19   : > { %p1507_p4 = pneg %p1506_p3  ;;  %p1511_p8 = por %p1510_p7, %p1509_p5 }
  0x1b   : > { %p1513_p13 = por %p1512_p9, %p1511_p8 }
  0x1d   : > { %p1514_p0 = pnand %p1513_p13, %p1507_p4 }
  0x1f   : > { %1517 = shalt.err (!%p1514_p0)
}
  0x20   : > { %s1518_s29 = scalar_lea.vmem %s1707_s10, 128  ;;  %s1601_s30 = smov [#allocation2]  }
  0x21   : > { %p1519_p1 = scmp.ne.s32.totalorder %s1707_s10, %s1518_s29  ;;  %s1523_s5 = sshll.u32 %s1601_s30, 4  ;;  %s1524_s5 = int_to_ptr.vmem [resolvable:$false] %s1523_s5 }
  0x22   : > { %s1525_s6 = scalar_lea.vmem %s1524_s5, 256  ;;  %p1526_p10 = scmp.lt.s32.totalorder %s1707_s10, %s1524_s5 }
  0x23   : > { %p1521_p3 = pnand %p1519_p1, %p1505_p2  ;;  %p1527_p5 = scmp.lt.s32.totalorder %s1525_s6, %s1518_s29 }
  0x25   : > { %p1522_p11 = pneg %p1521_p3  ;;  %p1528_p7 = por %p1527_p5, %p1526_p10 }
  0x27   : > { %p1529_p8 = pnand %p1528_p7, %p1522_p11 }
  0x29   : > { %1532 = shalt.err (!%p1529_p8)
}
  0x2a   : > { %1419 = dma.hbm_to_vmem [thread:$0]  (!%p1703_p12), %s1699_s8, 128, %s1707_s10, %s167_s12  }
  0x2b   : > { %p2022_p13 = scmp.lt.s32.totalorder %s1599_s18, 4  ;;  %p2023_p0 = scmp.ge.s32.totalorder %s1599_s18, 1 }
  0x2d   : > { %p197_p2 = pnand %p2023_p0, %p2022_p13 }
  0x2e   : > { %s1741_s7 = sand.u32 (!%p197_p2), 1, %s1591_s16  }
  0x2f   : > { %200 = sbr.rel (%p197_p2) target bundleno = 791 (0x317), region = 36  ;;  %s1139_s9 = sshll.u32 (!%p197_p2), %s1741_s7, 3 }
  0x30   : > { %s203_s13 = scalar_lea.sflag (!%p197_p2), [#allocation3], %s1741_s7  ;;  %s1747_s11 = scalar_lea.vmem (!%p197_p2), [#allocation2], %s1139_s9 }
  0x36   : > { %1578 = dma.done.wait (%p1680_p6), %s203_s13, 128  }
  0x37   : > { %1580 = vsyncadd (%p1680_p6), %s203_s13, 4294967168  ;;  %p239_p10 = scmp.lt.s32.totalorder %s1658_s19, 2  ;;  %v1602_v0 = vmov 0.0|0.0   ;;  %vm1603_vm0 = vmmov 0   ;;  %v1604_v1 = vmov 0.0   ;;  %v1605_v2 = vmov 0  }
  0x38   : > { %1317 = vmatprep.subr.bf16.mxu1 %v1602_v0  ;;  %1353 = vmatprep.subr.bf16.mxu0 %v1602_v0  ;;  %v249_v3 = vld [vmem:[%s2014_s3] sm:$0xff]  ;;  %v250_v4 = vld [vmem:[%s2014_s3 + $0x8] sm:$0xff]  ;;  %v251_v7 = vld [vmem:[%s2014_s3 + $0x10] sm:$0xff]  ;;  %v1606_v14 = vmov 2   ;;  %v1607_v18 = vmov 1   ;;  %v1608_v22 = vmov 3  }
  0x39   : > { %1219 = vmatprep.mubr.msk.f32.mxu1 %vm1603_vm0, %v1604_v1  ;;  %1276 = vmatprep.mubr.msk.f32.mxu0 %vm1603_vm0, %v1604_v1  ;;  %s240_s8 = scalar_select %p239_p10, %s1658_s19, 2  ;;  %v258_v5 = vand.u32 4294901760, %v249_v3  ;;  %v261_v6 = vand.u32 4294901760, %v250_v4  ;;  %v252_v8 = vld [vmem:[%s2014_s3 + $0x18] sm:$0xff]  ;;  %v264_v12 = vand.u32 4294901760, %v251_v7  ;;  %v253_v16 = vld [vmem:[%s2014_s3 + $0x20] sm:$0xff] }
  0x3a   : > { %1469 = vset.pattern.permute.xlu1 %v1605_v2  ;;  %1467 = vset.pattern.permute.xlu0 %v1605_v2  ;;  %v267_v13 = vand.u32 4294901760, %v252_v8  ;;  %v254_v17 = vld [vmem:[%s2014_s3 + $0x28] sm:$0xff]  ;;  %v270_v19 = vand.u32 4294901760, %v253_v16  ;;  %v1609_v24 = vmov 4   ;;  %v255_v28 = vld [vmem:[%s2014_s3 + $0x30] sm:$0xff]  ;;  %v256_v29 = vld [vmem:[%s2014_s3 + $0x38] sm:$0xff] }
  0x3b   : > { %s1141_s26 = sshll.u32 %s240_s8, 3  ;;  %v1779_v9 = vpack.c.bf16 %v261_v6, %v258_v5  ;;  %v273_v20 = vand.u32 4294901760, %v254_v17  ;;  %v248_v21 = vld [vmem:[%s1747_s11] sm:$0xff]  ;;  %v1800_v25 = vsub.f32 %v249_v3, %v258_v5  ;;  %v1802_v26 = vsub.f32 %v250_v4, %v261_v6  ;;  %s1143_s29 = sshll.u32 %s1658_s19, 3 }
  0x3c   : > { %s242_s25 = scalar_lea.vmem %s2012_s1, %s1141_s26  ;;  %s246_s5 = scalar_lea.vmem %s2013_s2, %s1141_s26  ;;  %v1785_v15 = vpack.c.bf16 %v267_v13, %v264_v12  ;;  %v1798_v23 = vand.u32 4294901760, %v248_v21  ;;  %v1610_v31 = vmov 5   ;;  %v276_v32 = vand.u32 4294901760, %v255_v28 }
  0x3d   : > { %v803_v10 = vld [vmem:[%s242_s25] sm:$0xff]  ;;  %1319 = vmatpush3.bf16.xpose.msra.mxu1 %v1779_v9  ;;  %1355 = vmatpush3.bf16.xpose.msra.mxu0 %v1779_v9  ;;  %v1804_v27 = vpack.c.bf16 %v273_v20, %v270_v19  ;;  %v279_v33 = vand.u32 4294901760, %v256_v29  ;;  %v343_v34 = vand.u32 4294901760, %v1800_v25  ;;  %v350_v35 = vand.u32 4294901760, %v1802_v26  ;;  %s1146_s11 = sshll.u32 %s1658_s19, 7  ;;  %s238_s25 = scalar_lea.vmem [#allocation5], %s1139_s9 }
  0x3e   : > { %v834_v11 = vld [vmem:[%s246_s5] sm:$0xff]  ;;  %805 = vperm.xlu1 %1469, %v803_v10   ;;  %1320 = vmatprep.subr.bf16.mxu1 %v1602_v0  ;;  %v1813_v30 = vsub.f32 %v248_v21, %v1798_v23  ;;  %v1821_v36 = vsub.f32 %v251_v7, %v264_v12  ;;  %v1824_v38 = vsub.f32 %v252_v8, %v267_v13  ;;  %v794_v21 = vlaneseq  ;;  %s1026_s19 = scalar_lea.sflag [#allocation4], %s1741_s7  ;;  %p2024_p11 = scmp.ne.s32.totalorder %s2019_s27, 0 }
  0x3f   : > { %1356 = vmatprep.subr.bf16.mxu0 %v1602_v0  ;;  %836 = vperm.xlu0 %1467, %v834_v11   ;;  %v1826_v39 = vpack.c.bf16 %v279_v33, %v276_v32  ;;  %v344_v40 = vsub.f32 %v1800_v25, %v343_v34  ;;  %v351_v41 = vsub.f32 %v1802_v26, %v350_v35  ;;  %vm809_vm2 = vcmask 523264   ;;  %s1611_s9 = smov [#allocation5]  }
  0x40   : > { %v332_v37 = vand.u32 4294901760, %v1813_v30  ;;  %v357_v45 = vand.u32 4294901760, %v1821_v36  ;;  %v364_v46 = vand.u32 4294901760, %v1824_v38  ;;  %v1837_v47 = vsub.f32 %v253_v16, %v270_v19 }
  0x41   : > { %v345_v43 = vand.u32 4294901760, %v344_v40  ;;  %v352_v44 = vand.u32 4294901760, %v351_v41  ;;  %v1839_v48 = vsub.f32 %v254_v17, %v273_v20  ;;  %v1366_v51 = vpack.c.bf16 %v350_v35, %v343_v34 }
  0x42   : > { %1470 = vset.pattern.permute.xlu1 %v1606_v14  ;;  %v333_v42 = vsub.f32 %v1813_v30, %v332_v37  ;;  %v358_v52 = vsub.f32 %v1821_v36, %v357_v45  ;;  %v365_v53 = vsub.f32 %v1824_v38, %v364_v46  ;;  %v371_v56 = vand.u32 4294901760, %v1837_v47 }
  0x43   : > { %896 = vperm.xlu1 %1470, %v834_v11   ;;  %1468 = vset.pattern.permute.xlu0 %v1607_v18  ;;  %v1330_v50 = vpack.c.bf16 %v352_v44, %v345_v43  ;;  %v378_v57 = vand.u32 4294901760, %v1839_v48  ;;  %v384_v58 = vsub.f32 %v255_v28, %v276_v32  ;;  %v391_v59 = vsub.f32 %v256_v29, %v279_v33 }
  0x44   : > { %866 = vperm.xlu0 %1468, %v834_v11   ;;  %v334_v49 = vand.u32 4294901760, %v333_v42  ;;  %v359_v54 = vand.u32 4294901760, %v358_v52  ;;  %v366_v55 = vand.u32 4294901760, %v365_v53  ;;  %v1369_v61 = vpack.c.bf16 %v364_v46, %v357_v45 }
  0x45   : > { %1322 = vmatpush3.bf16.xpose.msra.mxu1 %v1785_v15  ;;  %1358 = vmatpush3.bf16.xpose.msra.mxu0 %v1785_v15  ;;  %v372_v62 = vsub.f32 %v1837_v47, %v371_v56  ;;  %v379_v63 = vsub.f32 %v1839_v48, %v378_v57  ;;  %v385_v4 = vand.u32 4294901760, %v384_v58  ;;  %v392_v5 = vand.u32 4294901760, %v391_v59 }
  0x46   : > { %1323 = vmatprep.subr.bf16.mxu1 %v1602_v0  ;;  %1359 = vmatprep.subr.bf16.mxu0 %v1602_v0  ;;  %v1333_v60 = vpack.c.bf16 %v366_v55, %v359_v54  ;;  %v1372_v7 = vpack.c.bf16 %v378_v57, %v371_v56  ;;  %v1342_v16 = vpack.c.bf16 %v1802_v26, %v1800_v25  ;;  %vm823_vm10 = vcmask 7168  }
  0x47   : > { %1471 = vset.pattern.permute.xlu1 %v1608_v22  ;;  %v373_v2 = vand.u32 4294901760, %v372_v62  ;;  %v380_v3 = vand.u32 4294901760, %v379_v63  ;;  %v386_v8 = vsub.f32 %v384_v58, %v385_v4  ;;  %v393_v10 = vsub.f32 %v391_v59, %v392_v5 }
  0x48   : > { %926 = vperm.xlu1 %1471, %v834_v11   ;;  %1472 = vset.pattern.permute.xlu0 %v1609_v24  ;;  %v1375_v14 = vpack.c.bf16 %v392_v5, %v385_v4  ;;  %v1345_v17 = vpack.c.bf16 %v1824_v38, %v1821_v36  ;;  %v1351_v18 = vpack.c.bf16 %v391_v59, %v384_v58  ;;  %v1884_v24 = vand.u32 127, %v794_v21 }
  0x49   : > { %956 = vperm.xlu0 %1472, %v834_v11   ;;  %v1336_v6 = vpack.c.bf16 %v380_v3, %v373_v2  ;;  %v394_v12 = vand.u32 4294901760, %v393_v10 }
  0x4a   : > { %vm1018_vm12 = vcmp.eq.s32.totalorder %v1884_v24, 1  ;;  %vm1016_vm13 = vcmp.eq.s32.totalorder %v1884_v24, 0 }
  0x4c   : > { %1473 = vset.pattern.permute.xlu1 %v1610_v31 }
  0x4d   : > { %1325 = vmatpush3.bf16.xpose.msra.mxu1 %v1804_v27  ;;  %1361 = vmatpush3.bf16.xpose.msra.mxu0 %v1804_v27 }
  0x4e   : > { %1326 = vmatprep.subr.bf16.mxu1 %v1602_v0  ;;  %1362 = vmatprep.subr.bf16.mxu0 %v1602_v0 }
  0x4f   : > { %986 = vperm.xlu1 %1473, %v834_v11   ;;  %1474 = vset.pattern.permute.xlu0 %v1610_v31  ;;  %v387_v11 = vand.u32 4294901760, %v386_v8 }
  0x51   : > { %v1339_v13 = vpack.c.bf16 %v394_v12, %v387_v11 }
  0x55   : > { %1328 = vmatpush3.bf16.xpose.msra.mxu1 %v1826_v39  ;;  %1364 = vmatpush3.bf16.xpose.msra.mxu0 %v1826_v39 }
  0x56   : > { %1329 = vmatprep.subr.bf16.mxu1 %v1602_v0  ;;  %1365 = vmatprep.subr.bf16.mxu0 %v1602_v0 }
  0x5c   : > { %1220 = vmatmul.mubr.f32.vlgmr.msra.gmra.mrb[0].mxu1 %v334_v49  ;;  %1277 = vmatmul.mubr.f32.vlgmr.msra.gmra.mrb[0].mxu0 %v332_v37 }
  0x5d   : > { %1331 = vmatpush3.bf16.xpose.msra.mxu1 %v1330_v50  ;;  %1367 = vmatpush3.bf16.xpose.msra.mxu0 %v1366_v51 }
  0x5e   : > { %1332 = vmatprep.subr.bf16.mxu1 %v1602_v0  ;;  %1368 = vmatprep.subr.bf16.mxu0 %v1602_v0 }
  0x5f   : > { %1238 = vmatprep.mubr.msk.f32.mxu1 %vm1603_vm0, %v1604_v1  ;;  %1295 = vmatprep.mubr.msk.f32.mxu0 %vm1603_vm0, %v1604_v1 }
  0x65   : > { %1334 = vmatpush3.bf16.xpose.msra.mxu1 %v1333_v60  ;;  %1370 = vmatpush3.bf16.xpose.msra.mxu0 %v1369_v61 }
  0x66   : > { %1335 = vmatprep.subr.bf16.mxu1 %v1602_v0  ;;  %1371 = vmatprep.subr.bf16.mxu0 %v1602_v0 }
  0x6d   : > { %1337 = vmatpush3.bf16.xpose.msra.mxu1 %v1336_v6  ;;  %1373 = vmatpush3.bf16.xpose.msra.mxu0 %v1372_v7 }
  0x6e   : > { %1338 = vmatprep.subr.bf16.mxu1 %v1602_v0  ;;  %1374 = vmatprep.subr.bf16.mxu0 %v1602_v0 }
  0x75   : > { %1340 = vmatpush3.bf16.xpose.msra.mxu1 %v1339_v13  ;;  %1376 = vmatpush3.bf16.xpose.msra.mxu0 %v1375_v14 }
  0x76   : > { %1341 = vmatprep.subr.bf16.mxu1 %v1602_v0  ;;  %1377 = vmatprep.subr.bf16.mxu0 %v1602_v0 }
  0x7c   : > { %1239 = vmatmul.mubr.f32.vlgmr.msra.gmra.mrb[0].mxu1 %v1798_v23  ;;  %1296 = vmatmul.mubr.f32.vlgmr.msra.gmra.mrb[0].mxu0 %v1798_v23 }
  0x7d   : > { %1343 = vmatpush3.bf16.xpose.msra.mxu1 %v1342_v16  ;;  %1379 = vmatpush3.bf16.xpose.msra.mxu0 %v1779_v9  ;;  %v1348_v9 = vpack.c.bf16 %v1839_v48, %v1837_v47 }
  0x7e   : > { %1344 = vmatprep.subr.bf16.mxu1 %v1602_v0  ;;  %1380 = vmatprep.subr.bf16.mxu0 %v1602_v0 }
  0x7f   : > { %1257 = vmatprep.mubr.msk.f32.mxu1 %vm1603_vm0, %v1604_v1  ;;  %1314 = vmatprep.mubr.msk.f32.mxu0 %vm1603_vm0, %v1604_v1 }
  0x85   : > { %1346 = vmatpush3.bf16.xpose.msra.mxu1 %v1345_v17  ;;  %1382 = vmatpush3.bf16.xpose.msra.mxu0 %v1785_v15 }
  0x86   : > { %1347 = vmatprep.subr.bf16.mxu1 %v1602_v0  ;;  %1383 = vmatprep.subr.bf16.mxu0 %v1602_v0 }
  0x8d   : > { %1349 = vmatpush3.bf16.xpose.msra.mxu1 %v1348_v9  ;;  %1385 = vmatpush3.bf16.xpose.msra.mxu0 %v1804_v27 }
  0x8e   : > { %1350 = vmatprep.subr.bf16.mxu1 %v1602_v0  ;;  %1386 = vmatprep.subr.bf16.mxu0 %v1602_v0 }
  0x95   : > { %1352 = vmatpush3.bf16.xpose.msra.mxu1 %v1351_v18  ;;  %1388 = vmatpush3.bf16.xpose.msra.mxu0 %v1826_v39 }
  0x9c   : > { %1258 = vmatmul.mubr.f32.vlgmr.msra.gmra.mrb[0].mxu1 %v1813_v30  ;;  %1315 = vmatmul.mubr.f32.vlgmr.msra.gmra.mrb[0].mxu0 %v1798_v23 }
  0xbd   : > { %v806_v15 = vpop.permute.xlu1 %805 }
  0xbe   : > { %v837_v19 = vpop.permute.xlu0 %836  ;;  %vm807_vm3 = vcmp.eq.s32.totalorder %v1884_v24, %v806_v15 }
  0xbf   : > { %vm838_vm4 = vcmp.eq.s32.totalorder %v1884_v24, %v837_v19 }
  0xc2   : > { %v897_v20 = vpop.permute.xlu1 %896 }
  0xc3   : > { %v867_v22 = vpop.permute.xlu0 %866  ;;  %vm898_vm5 = vcmp.eq.s32.totalorder %v1884_v24, %v897_v20 }
  0xc4   : > { %vm868_vm1 = vcmp.eq.s32.totalorder %v1884_v24, %v867_v22 }
  0xc7   : > { %v927_v25 = vpop.permute.xlu1 %926 }
  0xc8   : > { %v957_v23 = vpop.permute.xlu0 %956  ;;  %vm928_vm6 = vcmp.eq.s32.totalorder %v1884_v24, %v927_v25 }
  0xc9   : > { %vm958_vm7 = vcmp.eq.s32.totalorder %v1884_v24, %v957_v23 }
  0xce   : > { %v987_v36 = vpop.permute.xlu1 %986 }
  0xcf   : > { %vm988_vm8 = vcmp.eq.s32.totalorder %v1884_v24, %v987_v36 }
 0x16f   : > { %v535_v0 = vpop.f32.mrb[0].mxu1  ;;  %v790_v26 = vpop.f32.mrb[0].mxu0 }
 0x170   : > { %v1389_v27 = vadd.f32 %v790_v26, %v535_v0  ;;  %v1259_v28 = vpop.f32.mrb[1].mxu1  ;;  %v1316_v29 = vpop.f32.mrb[1].mxu0  ;;  %v1935_v26 = vshrl.u32 %v794_v21, 7 }
 0x171   : > { %v796_v28 = vstv %s1143_s29  ;;  %s1039_s29 = sshll.u32 %s238_s25, 4  ;;  %s1970_s29 = int_to_ptr.vmem [resolvable:$true] %s1039_s29 }
 0x172   : > { %v869_v30 = vsel %vm868_vm1, %v1389_v27, 0.0  ;;  %v839_v31 = vsel %vm838_vm4, %v1389_v27, 0.0  ;;  %v899_v34 = vsel %vm898_vm5, %v1389_v27, 0.0  ;;  %v808_v35 = vsel %vm807_vm3, %v1389_v27, 0.0 }
 0x173   : > { %v870_v32 = vsel %vm809_vm2, %v869_v30, 0.0  ;;  %v840_v33 = vsel %vm809_vm2, %v839_v31, 0.0  ;;  %v900_v37 = vsel %vm809_vm2, %v899_v34, 0.0  ;;  %v810_v38 = vsel %vm809_vm2, %v808_v35, 0.0 }
 0x174   : > { %871 = vadd.xlane.f32.xlu0 %v870_v32  ;;  %841 = vadd.xlane.f32.xlu1 %v840_v33  ;;  %v959_v39 = vsel %vm958_vm7, %v1389_v27, 0.0  ;;  %v929_v40 = vsel %vm928_vm6, %v1389_v27, 0.0  ;;  %v989_v43 = vsel %vm988_vm8, %v1389_v27, 0.0  ;;  %v797_v31 = vadd.s32 %v796_v28, %v1935_v26 }
 0x175   : > { %v960_v41 = vsel %vm809_vm2, %v959_v39, 0.0  ;;  %v930_v42 = vsel %vm809_vm2, %v929_v40, 0.0  ;;  %v990_v44 = vsel %vm809_vm2, %v989_v43, 0.0  ;;  %vm1015_vm11 = vcmp.eq.s32.totalorder %v1935_v26, 0 }
 0x176   : > { %vm798_vm9 = vcmp.lt.s32.totalorder %v797_v31, 20  ;;  %vm1019_vm14 = vmand %vm1015_vm11, %vm1018_vm12 }
 0x177   : > { %v1144_v40 = vsel %vm798_vm9, 1.0, %v1604_v1  ;;  %vm1017_vm15 = vmand %vm1015_vm11, %vm1016_vm13 }
 0x178   : > { %901 = vadd.xlane.f32.xlu1 %v900_v37  ;;  %811 = vadd.xlane.f32.xlu0 %v810_v38 }
 0x17c   : > { %961 = vadd.xlane.f32.xlu1 %v960_v41  ;;  %931 = vadd.xlane.f32.xlu0 %v930_v42 }
 0x180   : > { %991 = vadd.xlane.f32.xlu0 %v990_v44 }
 0x201   : > { %v1900_v45 = vpop.xlane.xlu0 %871  ;;  %v1902_v46 = vpop.xlane.xlu1 %841 }
 0x202   : > { %v873_v47 = vsub.f32 0.0, %v1900_v45  ;;  %v843_v48 = vsub.f32 0.0, %v1902_v46 }
 0x204   : > { %v875_v49 = vand.u32 2147483647, %v873_v47  ;;  %v845_v50 = vand.u32 2147483647, %v843_v48  ;;  %v844_v21 = vmin.f32 %v843_v48, 0.0  ;;  %v874_v41 = vmin.f32 %v873_v47, 0.0 }
 0x205   : > { %v1910_v51 = vpop.xlane.xlu1 %901  ;;  %v1912_v52 = vpop.xlane.xlu0 %811 }
 0x206   : > { %v876_v53 = vsub.f32 0.0, %v875_v49  ;;  %v846_v54 = vsub.f32 0.0, %v845_v50  ;;  %v903_v55 = vsub.f32 0.0, %v1910_v51  ;;  %v814_v56 = vand.u32 2147483647, %v1912_v52 }
 0x207   : > { %v813_v42 = vmin.f32 %v1912_v52, 0.0 }
 0x208   : > { %v877_v57 = vmul.f32 1.442695, %v876_v53  ;;  %v847_v58 = vmul.f32 1.442695, %v846_v54  ;;  %v905_v59 = vand.u32 2147483647, %v903_v55 }
 0x209   : > { %v815_v60 = vsub.f32 0.0, %v814_v56  ;;  %v1918_v61 = vpop.xlane.xlu1 %961  ;;  %v1920_v62 = vpop.xlane.xlu0 %931  ;;  %v904_v50 = vmin.f32 %v903_v55, 0.0 }
 0x20a   : > { %1475 = vpow2.f32 %v877_v57  ;;  %v963_v63 = vsub.f32 0.0, %v1918_v61  ;;  %v933_v2 = vsub.f32 0.0, %v1920_v62  ;;  %v906_v3 = vsub.f32 0.0, %v905_v59 }
 0x20b   : > { %1477 = vpow2.f32 %v847_v58  ;;  %v816_v4 = vmul.f32 1.442695, %v815_v60 }
 0x20c   : > { %v965_v5 = vand.u32 2147483647, %v963_v63  ;;  %v935_v6 = vand.u32 2147483647, %v933_v2  ;;  %v907_v7 = vmul.f32 1.442695, %v906_v3 }
 0x20d   : > { %1479 = vpow2.f32 %v816_v4  ;;  %v1928_v8 = vpop.xlane.xlu0 %991  ;;  %v964_v52 = vmin.f32 %v963_v63, 0.0  ;;  %v934_v58 = vmin.f32 %v933_v2, 0.0 }
 0x20e   : > { %v966_v10 = vsub.f32 0.0, %v965_v5  ;;  %v936_v11 = vsub.f32 0.0, %v935_v6  ;;  %v993_v12 = vsub.f32 0.0, %v1928_v8  ;;  %1481 = vpow2.f32 %v907_v7 }
 0x210   : > { %v967_v13 = vmul.f32 1.442695, %v966_v10  ;;  %v937_v14 = vmul.f32 1.442695, %v936_v11  ;;  %v995_v16 = vand.u32 2147483647, %v993_v12 }
 0x211   : > { %v994_v2 = vmin.f32 %v993_v12, 0.0 }
 0x212   : > { %1483 = vpow2.f32 %v967_v13  ;;  %v996_v17 = vsub.f32 0.0, %v995_v16 }
 0x213   : > { %1485 = vpow2.f32 %v937_v14 }
 0x214   : > { %v1476_v9 = vpop.eup %1475  ;;  %v997_v19 = vmul.f32 1.442695, %v996_v17 }
 0x215   : > { %v1478_v18 = vpop.eup %1477  ;;  %v879_v15 = vadd.f32 1.0, %v1476_v9 }
 0x216   : > { %v849_v20 = vadd.f32 1.0, %v1478_v18 }
 0x217   : > { %v1480_v22 = vpop.eup %1479  ;;  %1487 = vlog2.f32 %v879_v15 }
 0x218   : > { %1489 = vlog2.f32 %v849_v20  ;;  %v818_v25 = vadd.f32 1.0, %v1480_v22  ;;  %v1482_v0 = vpop.eup %1481 }
 0x219   : > { %1491 = vpow2.f32 %v997_v19  ;;  %v909_v27 = vadd.f32 1.0, %v1482_v0 }
 0x21a   : > { %1493 = vlog2.f32 %v818_v25 }
 0x21b   : > { %1495 = vlog2.f32 %v909_v27 }
 0x21c   : > { %v1484_v29 = vpop.eup %1483 }
 0x21d   : > { %v1486_v23 = vpop.eup %1485  ;;  %v969_v30 = vadd.f32 1.0, %v1484_v29 }
 0x21e   : > { %v939_v32 = vadd.f32 1.0, %v1486_v23 }
 0x21f   : > { %1497 = vlog2.f32 %v969_v30 }
 0x220   : > { %1499 = vlog2.f32 %v939_v32 }
 0x221   : > { %v1488_v33 = vpop.eup %1487 }
 0x222   : > { %v1490_v34 = vpop.eup %1489  ;;  %v881_v37 = vmul.f32 0.6931472, %v1488_v33 }
 0x223   : > { %v1492_v35 = vpop.eup %1491  ;;  %v851_v36 = vmul.f32 0.6931472, %v1490_v34 }
 0x224   : > { %v1494_v38 = vpop.eup %1493  ;;  %v999_v39 = vadd.f32 1.0, %v1492_v35  ;;  %v882_v54 = vsub.f32 %v874_v41, %v881_v37 }
 0x225   : > { %v820_v43 = vmul.f32 0.6931472, %v1494_v38  ;;  %v852_v44 = vsub.f32 %v844_v21, %v851_v36  ;;  %v1496_v49 = vpop.eup %1495 }
 0x226   : > { %1501 = vlog2.f32 %v999_v39  ;;  %v911_v53 = vmul.f32 0.6931472, %v1496_v49  ;;  %v883_v60 = vmul.f32 %v1144_v40, %v882_v54 }
 0x227   : > { %v821_v46 = vsub.f32 %v813_v42, %v820_v43  ;;  %v853_v48 = vmul.f32 %v1144_v40, %v852_v44 }
 0x228   : > { %v912_v45 = vsub.f32 %v904_v50, %v911_v53  ;;  %v884_v61 = vsel %vm823_vm10, %v883_v60, 0.0 }
 0x229   : > { %v1498_v56 = vpop.eup %1497  ;;  %v854_v1 = vsel %vm823_vm10, %v853_v48, 0.0  ;;  %v822_v57 = vmul.f32 %v1144_v40, %v821_v46 }
 0x22a   : > { %v1500_v47 = vpop.eup %1499  ;;  %855 = vadd.xlane.f32.xlu0 %v854_v1  ;;  %v971_v51 = vmul.f32 0.6931472, %v1498_v56  ;;  %v913_v59 = vmul.f32 %v1144_v40, %v912_v45 }
 0x22b   : > { %v824_v55 = vsel %vm823_vm10, %v822_v57, 0.0  ;;  %v941_v3 = vmul.f32 0.6931472, %v1500_v47 }
 0x22c   : > { %825 = vadd.xlane.f32.xlu1 %v824_v55  ;;  %v972_v4 = vsub.f32 %v964_v52, %v971_v51  ;;  %v914_v5 = vsel %vm823_vm10, %v913_v59, 0.0 }
 0x22d   : > { %v942_v6 = vsub.f32 %v934_v58, %v941_v3 }
 0x22e   : > { %915 = vadd.xlane.f32.xlu0 %v914_v5  ;;  %v973_v7 = vmul.f32 %v1144_v40, %v972_v4 }
 0x22f   : > { %v943_v63 = vmul.f32 %v1144_v40, %v942_v6 }
 0x230   : > { %v1502_v10 = vpop.eup %1501  ;;  %885 = vadd.xlane.f32.xlu1 %v884_v61  ;;  %v974_v62 = vsel %vm823_vm10, %v973_v7, 0.0 }
 0x231   : > { %v1001_v11 = vmul.f32 0.6931472, %v1502_v10  ;;  %v944_v13 = vsel %vm823_vm10, %v943_v63, 0.0 }
 0x232   : > { %975 = vadd.xlane.f32.xlu0 %v974_v62 }
 0x233   : > { %v1002_v14 = vsub.f32 %v994_v2, %v1001_v11 }
 0x234   : > { %945 = vadd.xlane.f32.xlu1 %v944_v13 }
 0x235   : > { %v1003_v16 = vmul.f32 %v1144_v40, %v1002_v14 }
 0x237   : > { %v1004_v17 = vsel %vm823_vm10, %v1003_v16, 0.0 }
 0x238   : > { %1005 = vadd.xlane.f32.xlu1 %v1004_v17 }
 0x2b7   : > { %v856_v9 = vpop.xlane.xlu0 %855 }
 0x2b8   : > { %v857_v18 = vrot.slane %v856_v9, 4 }
 0x2b9   : > { %v826_v15 = vpop.xlane.xlu1 %825 }
 0x2ba   : > { %v858_v19 = vadd.f32 %v857_v18, %v856_v9  ;;  %v827_v20 = vrot.slane %v826_v15, 4 }
 0x2bb   : > { %v916_v22 = vpop.xlane.xlu0 %915 }
 0x2bc   : > { %v859_v25 = vrot.slane %v858_v19, 2  ;;  %v828_v0 = vadd.f32 %v827_v20, %v826_v15  ;;  %v917_v8 = vrot.slane %v916_v22, 4 }
 0x2bd   : > { %v886_v12 = vpop.xlane.xlu1 %885 }
 0x2be   : > { %v829_v27 = vrot.slane %v828_v0, 2  ;;  %v918_v28 = vadd.f32 %v917_v8, %v916_v22  ;;  %v887_v29 = vrot.slane %v886_v12, 4  ;;  %v860_v23 = vadd.f32 %v859_v25, %v858_v19 }
 0x2bf   : > { %v976_v30 = vpop.xlane.xlu0 %975 }
 0x2c0   : > { %v919_v31 = vrot.slane %v918_v28, 2  ;;  %v888_v32 = vadd.f32 %v887_v29, %v886_v12  ;;  %v977_v33 = vrot.slane %v976_v30, 4  ;;  %v830_v34 = vadd.f32 %v829_v27, %v828_v0 }
 0x2c1   : > { %v946_v35 = vpop.xlane.xlu1 %945  ;;  %v861_v21 = vrot.slane %v860_v23, 1 }
 0x2c2   : > { %v889_v36 = vrot.slane %v888_v32, 2  ;;  %v978_v37 = vadd.f32 %v977_v33, %v976_v30  ;;  %v947_v38 = vrot.slane %v946_v35, 4  ;;  %v831_v39 = vrot.slane %v830_v34, 1 }
 0x2c3   : > { %v920_v40 = vadd.f32 %v919_v31, %v918_v28  ;;  %v862_v50 = vadd.f32 %v861_v21, %v860_v23 }
 0x2c4   : > { %v979_v41 = vrot.slane %v978_v37, 2  ;;  %v948_v42 = vadd.f32 %v947_v38, %v946_v35  ;;  %v832_v43 = vadd.f32 %v831_v39, %v830_v34  ;;  %v890_v44 = vadd.f32 %v889_v36, %v888_v32 }
 0x2c5   : > { %v1006_v49 = vpop.xlane.xlu1 %1005  ;;  %v921_v46 = vrot.slane %v920_v40, 1 }
 0x2c6   : > { %v980_v48 = vadd.f32 %v979_v41, %v978_v37  ;;  %v949_v53 = vrot.slane %v948_v42, 2  ;;  %v1007_v54 = vrot.slane %v1006_v49, 4  ;;  %1398 = vpush %v832_v43  ;;  %v891_v56 = vrot.slane %v890_v44, 1 }
 0x2c7   : > { %1400 = vpush %v862_v50  ;;  %v922_v47 = vadd.f32 %v921_v46, %v920_v40 }
 0x2c8   : > { %v1008_v1 = vadd.f32 %v1007_v54, %v1006_v49  ;;  %v892_v57 = vadd.f32 %v891_v56, %v890_v44  ;;  %v950_v45 = vadd.f32 %v949_v53, %v948_v42  ;;  %v981_v52 = vrot.slane %v980_v48, 1 }
 0x2ca   : > { %v1009_v58 = vrot.slane %v1008_v1, 2  ;;  %1402 = vpush %v892_v57  ;;  %v951_v51 = vrot.slane %v950_v45, 1  ;;  %v982_v60 = vadd.f32 %v981_v52, %v980_v48 }
 0x2cb   : > { %1404 = vpush %v922_v47 }
 0x2cc   : > { %v1010_v55 = vadd.f32 %v1009_v58, %v1008_v1  ;;  %v952_v59 = vadd.f32 %v951_v51, %v950_v45 }
 0x2ce   : > { %1406 = vpush %v952_v59  ;;  %v1011_v3 = vrot.slane %v1010_v55, 1 }
 0x2cf   : > { %1408 = vpush %v982_v60 }
 0x2d0   : > { %v1012_v4 = vadd.f32 %v1011_v3, %v1010_v55 }
 0x2d2   : > { %1410 = vpush %v1012_v4 }
 0x2f7   : > { %s1399_s30 = spop %1398 }
 0x2f8   : > { %s1401_s5 = spop %1400  ;;  %v1022_v6 = vstv %s1399_s30  ;;  %s1537_s30 = sshll.u32 %s1611_s9, 4  ;;  %s1538_s30 = int_to_ptr.vmem [resolvable:$false] %s1537_s30 }
 0x2f9   : > { %p1540_p9 = scmp.lt.s32.totalorder %s1970_s29, %s1538_s30 }
 0x2fb   : > { %s1403_s6 = spop %1402 }
 0x2fc   : > { %s894_s13 = sadd.f32 %s1403_s6, %s1401_s5  ;;  %s1405_s8 = spop %1404 }
 0x2fe   : > { %s924_s10 = sadd.f32 %s1405_s8, %s894_s13  ;;  %s1968_s13 = scalar_lea.hbm %s2015_s4, %s1146_s11 }
 0x2ff   : > { %s1407_s26 = spop %1406  ;;  %s1533_s8 = scalar_lea.vmem %s1970_s29, 128 }
 0x300   : > { %s954_s12 = sadd.f32 %s1407_s26, %s924_s10  ;;  %s1409_s14 = spop %1408 }
 0x301   : > { %p1534_p6 = scmp.ne.s32.totalorder %s1970_s29, %s1533_s8  ;;  %s1539_s10 = scalar_lea.vmem %s1538_s30, 256 }
 0x302   : > { %s984_s20 = sadd.f32 %s1409_s14, %s954_s12  ;;  %p1541_p1 = scmp.lt.s32.totalorder %s1539_s10, %s1533_s8 }
 0x303   : > { %s1411_s22 = spop %1410  ;;  %p1535_p12 = pnand %p1534_p6, %p2024_p11 }
 0x304   : > { %s1014_s23 = sadd.f32 %s1411_s22, %s984_s20  ;;  %p1542_p3 = por %p1541_p1, %p1540_p9 }
 0x305   : > { %p1536_p4 = pneg %p1535_p12 }
 0x306   : > { %v1020_v5 = vstv %s1014_s23 }
 0x307   : > { %v1021_v7 = vsel %vm1019_vm14, %v1020_v5, 0.0  ;;  %p1543_p5 = pnand %p1542_p3, %p1536_p4 }
 0x308   : > { %v1023_v24 = vsel %vm1017_vm15, %v1022_v6, %v1021_v7 }
 0x309   : > { %1024 = vst [vmem:[%s238_s25] sm:$0xff] %v1023_v24 }
 0x30a   : > { %1546 = shalt.err (!%p1543_p5)
}
 0x30b   : > { %s1547_s7 = scalar_lea.hbm %s1968_s13, 128  ;;  %s1551_s14 = scalar_lea.hbm %s2015_s4, 384 }
 0x30c   : > { %p1548_p7 = scmp.ne.s32.totalorder %s1968_s13, %s1547_s7  ;;  %p1552_p0 = scmp.lt.u32.totalorder %s1968_s13, %s2015_s4 }
 0x30d   : > { %p1553_p2 = scmp.lt.u32.totalorder %s1551_s14, %s1547_s7  ;;  %p1555_p6 = scmp.lt.u32.totalorder %s1547_s7, %s1968_s13 }
 0x30e   : > { %p1549_p8 = pnand %p1548_p7, %p2024_p11 }
 0x30f   : > { %p1554_p10 = por %p1553_p2, %p1552_p0 }
 0x310   : > { %p1550_p13 = pneg %p1549_p8 }
 0x311   : > { %p1556_p12 = por %p1555_p6, %p1554_p10 }
 0x313   : > { %p1557_p4 = pnand %p1556_p12, %p1550_p13 }
 0x315   : > { %1560 = shalt.err (!%p1557_p4)
}
 0x316   : > { %1414 = dma.vmem_to_hbm [thread:$0]  (%p2024_p11), %s1970_s29, 128, %s1968_s13, %s1026_s19  }
 0x317 PF: > { %p1425_p9 = scmp.ge.s32.totalorder %s1599_s18, 2  ;;  %s1051_s11 = sand.u32 1, %s1587_s15  }
 0x318   : > { %p2025_p1 = scmp.ne.s32.totalorder %s2020_s28, 0  ;;  %s1052_s23 = scalar_lea.sflag [#allocation4], %s1051_s11 }
 0x31a   : > { %p1421_p3 = pnand %p1425_p9, %p2025_p1 }
 0x31c   : > { %1582 = dma.done.wait (!%p1421_p3), %s1052_s23, 128  }
 0x31d   : > { %1584 = vsyncadd (!%p1421_p3), %s1052_s23, 4294967168  ;;  %p17_p5 = scmp.ge.s32.totalorder %s1662_s21, 5   ;;  %s2026_s15 = smov %s1591_s16 }
 0x31e   : > { %s2027_s16 = smov %s1595_s17  ;;  %s2028_s17 = smov %s1674_s24 }
 0x31f   : > { %s2029_s18 = smov %s1662_s21  ;;  %19 = sbr.rel (!%p17_p5) target bundleno = 5 (0x5), region = 87 }
 0x326   :  { %1057 = vsyncpa [#allocation3], 1 }
 0x327   :  { %1059 = vsyncpa [#allocation3 + $0x1], 1 }
 0x328   :  { %1060 = vsyncpa [#allocation4], 1 }
 0x329   :  { %1062 = vsyncpa [#allocation4 + $0x1], 1 }

</bundles_post_ra>
